<compile_context>
chip_gen: v7x
topology: tpu7x:2x2x1
jax: 0.10.0
libtpu: 0.0.40
codegen_flags: <defaults>
</compile_context>

<pallas_src>
import jax
import jax.numpy as jnp
from jax.experimental import pallas as pl
from jax.experimental.pallas import tpu as pltpu


def _round_up(n, m):
    return ((n + m - 1) // m) * m


def _make_mlp_kernel(n_layers):
    """Fused N-layer MLP kernel: Linear -> ReLU (hidden) -> Linear -> Sigmoid."""

    def kernel(*refs):
        x_ref = refs[0]
        o_ref = refs[-1]
        wb_refs = refs[1:-1]                     # (w0, b0, w1, b1, ..., w_{L-1}, b_{L-1})

        h = x_ref[...]                           # bf16 activations, f32 accumulation
        for i in range(n_layers):                # static unroll (traced once)
            w_ref = wb_refs[2 * i]
            b_ref = wb_refs[2 * i + 1]
            h = jnp.dot(h.astype(w_ref.dtype), w_ref[...],
                        preferred_element_type=jnp.float32)
            h = h + b_ref[...]                   # (1,d) + (TM,d) single VPU add, f32
            if i < n_layers - 1:
                h = jnp.maximum(h, 0.0)          # ReLU

        # sigmoid = 1 / (1 + exp(-h)); exp + approx reciprocal both run in the
        # otherwise-idle EUP slot instead of an iterative VALU f32 divide.
        denom = 1.0 + jnp.exp(-h)
        o_ref[...] = pl.reciprocal(denom, approx=True).astype(o_ref.dtype)

    return kernel


def single_arg_classification(x, params):
    """Forward pass of SingleArgClassification(layers).

    x:      (B, d0) float32
    params: list of (W_i, b_i) with W_i shape (d_in, d_out), b_i shape (1, d_out)
    returns (B, d_last) float32 = sigmoid(Linear(ReLU(...ReLU(Linear(x))...)))
    """
    n_layers = len(params)
    B, d0 = x.shape
    d_last = params[-1][0].shape[1]

    # ---- lane-dense padded geometry -------------------------------------------------
    LANE = 128
    SUBLANE = 8
    dims = [d0] + [w.shape[1] for (w, _) in params]
    dims_p = [_round_up(d, LANE) for d in dims]

    # Batch tile: big enough for pipelining, multiple of the 8-row sublane.
    TM = min(512, _round_up(B, SUBLANE))
    Bp = _round_up(B, TM)
    grid = (Bp // TM,)

    # ---- pad + cast operands at the pallas_call boundary ----------------------------
    x_p = jnp.pad(x, ((0, Bp - B), (0, dims_p[0] - dims[0]))).astype(jnp.bfloat16)

    flat_args = [x_p]
    in_specs = [pl.BlockSpec((TM, dims_p[0]), lambda i: (i, 0))]
    for li, (w, b) in enumerate(params):
        din, dout = dims[li], dims[li + 1]
        din_p, dout_p = dims_p[li], dims_p[li + 1]
        w_p = jnp.pad(w, ((0, din_p - din), (0, dout_p - dout))).astype(jnp.bfloat16)
        b_p = jnp.pad(b, ((0, 0), (0, dout_p - dout))).astype(jnp.float32)  # bias add in f32
        flat_args += [w_p, b_p]
        # Weights/biases resident across the batch grid (same block every iteration).
        in_specs += [pl.BlockSpec(w_p.shape, lambda i: (0, 0)),
                     pl.BlockSpec(b_p.shape, lambda i: (0, 0))]

    out_specs = pl.BlockSpec((TM, dims_p[-1]), lambda i: (i, 0))
    out_shape = jax.ShapeDtypeStruct((Bp, dims_p[-1]), jnp.float32)

    # ---- VMEM budget (sized against v7x's 64 MiB physical / 32 MiB default scope) ---
    bytes_x = 2 * TM * dims_p[0] * 2                       # double-buffered bf16 x tile
    bytes_o = 2 * TM * dims_p[-1] * 4                      # double-buffered f32 out tile
    bytes_w = 2 * sum(a.size * a.dtype.itemsize for a in flat_args[1:])
    vmem_limit = min(48 << 20, int(1.5 * (bytes_x + bytes_o + bytes_w)) + (4 << 20))

    # ---- advisory cost estimate (lets XLA schedule around the custom call) ----------
    flops = 2 * B * sum(dims[i] * dims[i + 1] for i in range(n_layers))
    bytes_accessed = (x_p.size * 2
                      + sum(a.size * a.dtype.itemsize for a in flat_args[1:])
                      + Bp * dims_p[-1] * 4)
    cost = pl.CostEstimate(flops=flops, transcendentals=B * d_last,
                           bytes_accessed=bytes_accessed)

    out_padded = pl.pallas_call(
        _make_mlp_kernel(n_layers),
        out_shape=out_shape,
        grid=grid,
        in_specs=in_specs,
        out_specs=out_specs,
        compiler_params=pltpu.CompilerParams(
            dimension_semantics=("parallel",),    # 2 TCs on v7x; harmless on v5e/v6e
            vmem_limit_bytes=vmem_limit,
        ),
        cost_estimate=cost,
    )(*flat_args)

    # Strip batch / feature padding.
    return out_padded[:B, :d_last]


def init_params(key, layers):
    """Deterministic init mimicking torch.nn.Linear's U(-1/sqrt(fan_in), +1/sqrt(fan_in))."""
    params = []
    for i in range(len(layers) - 1):
        fan_in, fan_out = layers[i], layers[i + 1]
        key, kw, kb = jax.random.split(key, 3)
        bound = 1.0 / (fan_in ** 0.5)
        w = jax.random.uniform(kw, (fan_in, fan_out), jnp.float32, -bound, bound)
        b = jax.random.uniform(kb, (1, fan_out), jnp.float32, -bound, bound)
        params.append((w, b))
    return params


def reference_forward(x, params):
    h = x
    n = len(params)
    for i, (w, b) in enumerate(params):
        h = h @ w + b
        if i < n - 1:
            h = jnp.maximum(h, 0.0)
    return jax.nn.sigmoid(h)


if __name__ == "__main__":
    layers = [32, 64, 48, 16]   # layers arg of SingleArgClassification
    batch = 8

    key = jax.random.PRNGKey(0)
    key, kx = jax.random.split(key)
    x = jax.random.normal(kx, (batch, layers[0]), jnp.float32)
    params = init_params(key, layers)

    out = single_arg_classification(x, params)
    out = jax.block_until_ready(out)

    ref = reference_forward(x, params)
    assert out.shape == (batch, layers[-1])
    # bf16 MXU operands + approx EUP reciprocal vs f32 reference: loose-but-tight-enough
    # tolerance (sigmoid output is in [0,1]; observed error is O(1e-3)).
    assert jnp.allclose(out, ref, atol=2e-2, rtol=2e-2), "mismatch vs JAX reference"

    print("KERNEL_OK")
</pallas_src>

<mosaic_0001>
module attributes {stable_mosaic.version = 11 : i64} {
  func.func @kernel(%arg0: i32, %arg1: memref<8x128xbf16, #tpu.memory_space<vmem>>, %arg2: memref<128x128xbf16, #tpu.memory_space<vmem>>, %arg3: memref<1x128xf32, #tpu.memory_space<vmem>>, %arg4: memref<128x128xbf16, #tpu.memory_space<vmem>>, %arg5: memref<1x128xf32, #tpu.memory_space<vmem>>, %arg6: memref<128x128xbf16, #tpu.memory_space<vmem>>, %arg7: memref<1x128xf32, #tpu.memory_space<vmem>>, %arg8: memref<8x128xf32, #tpu.memory_space<vmem>>) attributes {dimension_semantics = [#tpu.dimension_semantics<parallel>], iteration_bounds = array<i64: 1>, scalar_prefetch = 0 : i64, scratch_operands = 0 : i64, tpu.core_type = #tpu.core_type<tc>, window_params = [{transform_indices = @transform_0, window_bounds = array<i64: 8, 128>}, {pipeline_mode = #tpu.pipeline_mode<synchronous>, transform_indices = @transform_1, window_bounds = array<i64: 128, 128>}, {pipeline_mode = #tpu.pipeline_mode<synchronous>, transform_indices = @transform_2, window_bounds = array<i64: 1, 128>}, {pipeline_mode = #tpu.pipeline_mode<synchronous>, transform_indices = @transform_3, window_bounds = array<i64: 128, 128>}, {pipeline_mode = #tpu.pipeline_mode<synchronous>, transform_indices = @transform_4, window_bounds = array<i64: 1, 128>}, {pipeline_mode = #tpu.pipeline_mode<synchronous>, transform_indices = @transform_5, window_bounds = array<i64: 128, 128>}, {pipeline_mode = #tpu.pipeline_mode<synchronous>, transform_indices = @transform_6, window_bounds = array<i64: 1, 128>}, {transform_indices = @transform_7, window_bounds = array<i64: 8, 128>}]} {
    %c0 = arith.constant 0 : index
    %c0_0 = arith.constant 0 : index
    %0 = vector.load %arg1[%c0, %c0_0] : memref<8x128xbf16, #tpu.memory_space<vmem>>, vector<8x128xbf16>
    %c0_1 = arith.constant 0 : index
    %c0_2 = arith.constant 0 : index
    %1 = vector.load %arg2[%c0_1, %c0_2] : memref<128x128xbf16, #tpu.memory_space<vmem>>, vector<128x128xbf16>
    %cst = arith.constant dense<0.000000e+00> : vector<8x128xf32>
    %2 = tpu.matmul %0, %1, %cst {dimension_numbers = #tpu.dot_dimension_numbers<[1], [0], [0], [1], [0, 0, 1, 1], [], []>} : vector<8x128xbf16>, vector<128x128xbf16>, vector<8x128xf32> -> vector<8x128xf32>
    %c0_3 = arith.constant 0 : index
    %c0_4 = arith.constant 0 : index
    %3 = vector.load %arg3[%c0_3, %c0_4] : memref<1x128xf32, #tpu.memory_space<vmem>>, vector<1x128xf32>
    %4 = vector.broadcast %3 : vector<1x128xf32> to vector<8x128xf32>
    %5 = arith.addf %2, %4 : vector<8x128xf32>
    %cst_5 = arith.constant 0.000000e+00 : f32
    %6 = vector.broadcast %cst_5 : f32 to vector<8x128xf32>
    %7 = arith.maximumf %5, %6 : vector<8x128xf32>
    %8 = arith.truncf %7 : vector<8x128xf32> to vector<8x128xbf16>
    %c0_6 = arith.constant 0 : index
    %c0_7 = arith.constant 0 : index
    %9 = vector.load %arg4[%c0_6, %c0_7] : memref<128x128xbf16, #tpu.memory_space<vmem>>, vector<128x128xbf16>
    %cst_8 = arith.constant dense<0.000000e+00> : vector<8x128xf32>
    %10 = tpu.matmul %8, %9, %cst_8 {dimension_numbers = #tpu.dot_dimension_numbers<[1], [0], [0], [1], [0, 0, 1, 1], [], []>} : vector<8x128xbf16>, vector<128x128xbf16>, vector<8x128xf32> -> vector<8x128xf32>
    %c0_9 = arith.constant 0 : index
    %c0_10 = arith.constant 0 : index
    %11 = vector.load %arg5[%c0_9, %c0_10] : memref<1x128xf32, #tpu.memory_space<vmem>>, vector<1x128xf32>
    %12 = vector.broadcast %11 : vector<1x128xf32> to vector<8x128xf32>
    %13 = arith.addf %10, %12 : vector<8x128xf32>
    %cst_11 = arith.constant 0.000000e+00 : f32
    %14 = vector.broadcast %cst_11 : f32 to vector<8x128xf32>
    %15 = arith.maximumf %13, %14 : vector<8x128xf32>
    %16 = arith.truncf %15 : vector<8x128xf32> to vector<8x128xbf16>
    %c0_12 = arith.constant 0 : index
    %c0_13 = arith.constant 0 : index
    %17 = vector.load %arg6[%c0_12, %c0_13] : memref<128x128xbf16, #tpu.memory_space<vmem>>, vector<128x128xbf16>
    %cst_14 = arith.constant dense<0.000000e+00> : vector<8x128xf32>
    %18 = tpu.matmul %16, %17, %cst_14 {dimension_numbers = #tpu.dot_dimension_numbers<[1], [0], [0], [1], [0, 0, 1, 1], [], []>} : vector<8x128xbf16>, vector<128x128xbf16>, vector<8x128xf32> -> vector<8x128xf32>
    %c0_15 = arith.constant 0 : index
    %c0_16 = arith.constant 0 : index
    %19 = vector.load %arg7[%c0_15, %c0_16] : memref<1x128xf32, #tpu.memory_space<vmem>>, vector<1x128xf32>
    %20 = vector.broadcast %19 : vector<1x128xf32> to vector<8x128xf32>
    %21 = arith.addf %18, %20 : vector<8x128xf32>
    %cst_17 = arith.constant 0.000000e+00 : f32
    %22 = vector.broadcast %cst_17 : f32 to vector<8x128xf32>
    %23 = arith.subf %22, %21 : vector<8x128xf32>
    %24 = math.exp %23 : vector<8x128xf32>
    %cst_18 = arith.constant 1.000000e+00 : f32
    %25 = vector.broadcast %cst_18 : f32 to vector<8x128xf32>
    %26 = arith.addf %25, %24 : vector<8x128xf32>
    %27 = tpu.reciprocal %26 {approx = true} : vector<8x128xf32> -> vector<8x128xf32>
    %c0_19 = arith.constant 0 : index
    %c0_20 = arith.constant 0 : index
    %28 = vector.load %arg8[%c0_19, %c0_20] : memref<8x128xf32, #tpu.memory_space<vmem>>, vector<8x128xf32>
    tpu.vector_store %arg8[%c0_19, %c0_20], %27 {strides = array<i32>} : memref<8x128xf32, #tpu.memory_space<vmem>>, vector<8x128xf32>,
    return
  }
  func.func @transform_0(%arg0: i32) -> (i32, i32) {
    %c0_i32 = arith.constant 0 : i32
    %c0_i32_0 = arith.constant 0 : i32
    return %arg0, %c0_i32 : i32, i32
  }
  func.func @transform_1(%arg0: i32) -> (i32, i32) {
    %c0_i32 = arith.constant 0 : i32
    %c0_i32_0 = arith.constant 0 : i32
    %c0_i32_1 = arith.constant 0 : i32
    return %c0_i32, %c0_i32_0 : i32, i32
  }
  func.func @transform_2(%arg0: i32) -> (i32, i32) {
    %c0_i32 = arith.constant 0 : i32
    %c0_i32_0 = arith.constant 0 : i32
    %c0_i32_1 = arith.constant 0 : i32
    return %c0_i32, %c0_i32_0 : i32, i32
  }
  func.func @transform_3(%arg0: i32) -> (i32, i32) {
    %c0_i32 = arith.constant 0 : i32
    %c0_i32_0 = arith.constant 0 : i32
    %c0_i32_1 = arith.constant 0 : i32
    return %c0_i32, %c0_i32_0 : i32, i32
  }
  func.func @transform_4(%arg0: i32) -> (i32, i32) {
    %c0_i32 = arith.constant 0 : i32
    %c0_i32_0 = arith.constant 0 : i32
    %c0_i32_1 = arith.constant 0 : i32
    return %c0_i32, %c0_i32_0 : i32, i32
  }
  func.func @transform_5(%arg0: i32) -> (i32, i32) {
    %c0_i32 = arith.constant 0 : i32
    %c0_i32_0 = arith.constant 0 : i32
    %c0_i32_1 = arith.constant 0 : i32
    return %c0_i32, %c0_i32_0 : i32, i32
  }
  func.func @transform_6(%arg0: i32) -> (i32, i32) {
    %c0_i32 = arith.constant 0 : i32
    %c0_i32_0 = arith.constant 0 : i32
    %c0_i32_1 = arith.constant 0 : i32
    return %c0_i32, %c0_i32_0 : i32, i32
  }
  func.func @transform_7(%arg0: i32) -> (i32, i32) {
    %c0_i32 = arith.constant 0 : i32
    %c0_i32_0 = arith.constant 0 : i32
    return %arg0, %c0_i32 : i32, i32
  }
}

</mosaic_0001>

<bundles_post_ra>
// kernel: tpu_custom_call.1
= control target key start
LH: loop header
LB: loop body
LE: loop exit
PB: predicated region body
PF: predicated region fallthrough
CT: control target
= control target key end

     0   :  { %12 = vsyncpa [#allocation3], 0  ;;  %s868_s0 = inlined_call_operand.hbm [shape: bf16[8,128], index: 0, kind: input, shape index: {}]   ;;  %s869_s1 = inlined_call_operand.hbm [shape: bf16[128,128], index: 1, kind: input, shape index: {}]   ;;  %s870_s2 = inlined_call_operand.vmem [shape: f32[1,128], index: 2, kind: input, shape index: {}]   ;;  %s871_s3 = inlined_call_operand.hbm [shape: bf16[128,128], index: 3, kind: input, shape index: {}]   ;;  %s872_s4 = inlined_call_operand.vmem [shape: f32[1,128], index: 4, kind: input, shape index: {}]   ;;  %s873_s5 = inlined_call_operand.hbm [shape: bf16[128,128], index: 5, kind: input, shape index: {}]   ;;  %s874_s6 = inlined_call_operand.vmem [shape: f32[1,128], index: 6, kind: input, shape index: {}]   ;;  %s875_s7 = inlined_call_operand.hbm [shape: f32[8,128], index: 7, kind: output, shape index: {}]  }
   0x1   :  { %13 = vsyncpa [#allocation6], 0 }
   0x2   :  { %14 = vsyncpa [#allocation9], 0 }
   0x3   :  { %15 = vsyncpa [#allocation4], 0  ;;  %s711_s24 = smov [#allocation5]   ;;  %s593_s28 = scalar_lea.hbm %s869_s1, 1024 }
   0x4   :  { %s31_s25 = sshll.u32 %s711_s24, 4  ;;  %p594_p0 = scmp.ne.s32.totalorder %s869_s1, %s593_s28  ;;  %s32_s25 = int_to_ptr.vmem [resolvable:$true] %s31_s25 }
   0x5   :  { %p597_p1 = scmp.lt.u32.totalorder %s593_s28, %s869_s1 }
   0x7   :  { %p599_p2 = pnand %p597_p1, %p594_p0 }
   0x9   :  { %602 = shalt.err (!%p599_p2)
}
   0xa   :  { %s603_s10 = scalar_lea.vmem %s32_s25, 1024  ;;  %p608_p4 = scmp.lt.s32.totalorder %s32_s25, %s32_s25 }
   0xb   :  { %p604_p3 = scmp.ne.s32.totalorder %s32_s25, %s603_s10  ;;  %p609_p5 = scmp.lt.s32.totalorder %s603_s10, %s603_s10 }
   0xd   :  { %p610_p6 = por %p609_p5, %p608_p4 }
   0xf   :  { %p611_p7 = pnand %p610_p6, %p604_p3 }
  0x11   :  { %614 = shalt.err (!%p611_p7)
}
  0x12   :  { %s712_s11 = smov 64   ;;  %s713_s12 = smov 4  }
  0x13   :  { %37 = dma.hbm_to_vmem [thread:$0]  %s869_s1, 1024, %s32_s25, [#allocation6], %s712_s11, %s712_s11, %s713_s12  }
  0x14   :  { %s714_s15 = smov [#allocation2]   ;;  %s715_s17 = smov [#allocation7]  }
  0x15   :  { %s22_s16 = sshll.u32 %s714_s15, 4  ;;  %s45_s18 = sshll.u32 %s715_s17, 4  ;;  %s23_s16 = int_to_ptr.vmem [resolvable:$true] %s22_s16  ;;  %s46_s18 = int_to_ptr.vmem [resolvable:$true] %s45_s18 }
  0x16   :  { %s615_s21 = scalar_lea.hbm %s868_s0, 64 }
  0x17   :  { %p616_p8 = scmp.ne.s32.totalorder %s868_s0, %s615_s21  ;;  %p619_p9 = scmp.lt.u32.totalorder %s615_s21, %s868_s0 }
  0x19   :  { %p621_p10 = pnand %p619_p9, %p616_p8 }
  0x1b   :  { %624 = shalt.err (!%p621_p10)
}
  0x1c   :  { %s625_s1 = scalar_lea.vmem %s23_s16, 64  ;;  %p630_p12 = scmp.lt.s32.totalorder %s23_s16, %s23_s16 }
  0x1d   :  { %p626_p11 = scmp.ne.s32.totalorder %s23_s16, %s625_s1  ;;  %p631_p13 = scmp.lt.s32.totalorder %s625_s1, %s625_s1 }
  0x1f   :  { %p632_p0 = por %p631_p13, %p630_p12 }
  0x21   :  { %p633_p1 = pnand %p632_p0, %p626_p11 }
  0x23   :  { %636 = shalt.err (!%p633_p1)
}
  0x24   :  { %25 = dma.hbm_to_vmem [thread:$0]  %s868_s0, 64, %s23_s16, [#allocation3]  }
  0x25   :  { %s637_s30 = scalar_lea.hbm %s871_s3, 1024 }
  0x26   :  { %p638_p2 = scmp.ne.s32.totalorder %s871_s3, %s637_s30  ;;  %p641_p3 = scmp.lt.u32.totalorder %s637_s30, %s871_s3 }
  0x28   :  { %p643_p4 = pnand %p641_p3, %p638_p2 }
  0x2a   :  { %646 = shalt.err (!%p643_p4)
}
  0x2b   :  { %s647_s14 = scalar_lea.vmem %s46_s18, 1024  ;;  %p652_p6 = scmp.lt.s32.totalorder %s46_s18, %s46_s18 }
  0x2c   :  { %p648_p5 = scmp.ne.s32.totalorder %s46_s18, %s647_s14  ;;  %p653_p7 = scmp.lt.s32.totalorder %s647_s14, %s647_s14 }
  0x2e   :  { %p654_p8 = por %p653_p7, %p652_p6 }
  0x30   :  { %p655_p9 = pnand %p654_p8, %p648_p5 }
  0x32   :  { %658 = shalt.err (!%p655_p9)
}
  0x33   :  { %51 = dma.hbm_to_vmem [thread:$0]  %s871_s3, 1024, %s46_s18, [#allocation6], %s712_s11, %s712_s11, %s713_s12  }
  0x34   :  { %s716_s16 = smov [#allocation8]   ;;  %s659_s21 = scalar_lea.hbm %s873_s5, 1024 }
  0x35   :  { %s59_s17 = sshll.u32 %s716_s16, 4  ;;  %p660_p10 = scmp.ne.s32.totalorder %s873_s5, %s659_s21  ;;  %s60_s17 = int_to_ptr.vmem [resolvable:$true] %s59_s17 }
  0x36   :  { %p663_p11 = scmp.lt.u32.totalorder %s659_s21, %s873_s5 }
  0x38   :  { %p665_p12 = pnand %p663_p11, %p660_p10 }
  0x3a   :  { %668 = shalt.err (!%p665_p12)
}
  0x3b   :  { %s669_s1 = scalar_lea.vmem %s60_s17, 1024  ;;  %p674_p0 = scmp.lt.s32.totalorder %s60_s17, %s60_s17 }
  0x3c   :  { %p670_p13 = scmp.ne.s32.totalorder %s60_s17, %s669_s1  ;;  %p675_p1 = scmp.lt.s32.totalorder %s669_s1, %s669_s1 }
  0x3e   :  { %p676_p2 = por %p675_p1, %p674_p0 }
  0x40   :  { %p677_p3 = pnand %p676_p2, %p670_p13 }
  0x42   :  { %680 = shalt.err (!%p677_p3)
}
  0x43   :  { %65 = dma.hbm_to_vmem [thread:$0]  %s873_s5, 1024, %s60_s17, [#allocation9], %s712_s11, %s712_s11, %s713_s12  }
  0x44   :  { %703 = dma.done.wait [#allocation3], 64  }
  0x45   :  { %704 = vsyncadd [#allocation3], 4294967232 }
  0x46   :  { %705 = dma.done.wait [#allocation6], 2048  }
  0x47   :  { %706 = vsyncadd [#allocation6], 4294965248 }
  0x48   :  { %707 = dma.done.wait [#allocation9], 1024  }
  0x49   :  { %708 = vsyncadd [#allocation9], 4294966272  ;;  %v717_v0 = vmov 0.0   ;;  %vm718_vm0 = vmmov 0   ;;  %v565_v1 = vld [vmem:[#allocation5] sm:$0xff]   ;;  %v566_v2 = vld [vmem:[#allocation5 + $0x8] sm:$0xff]  }
  0x4a   :  { %496 = vmatprep.subr.bf16.mxu0 %v717_v0  ;;  %512 = vmatprep.mubr.msk.bf16.mxu0 %vm718_vm0, %v717_v0  ;;  %v567_v3 = vld [vmem:[#allocation5 + $0x10] sm:$0xff]   ;;  %v573_v4 = vld [vmem:[#allocation7] sm:$0xff]   ;;  %v568_v5 = vld [vmem:[#allocation5 + $0x18] sm:$0xff]  }
  0x4b   :  { %516 = vmatprep.subr.bf16.mxu1 %v717_v0  ;;  %532 = vmatprep.mubr.msk.bf16.mxu1 %vm718_vm0, %v717_v0  ;;  %v574_v6 = vld [vmem:[#allocation7 + $0x8] sm:$0xff]   ;;  %v569_v7 = vld [vmem:[#allocation5 + $0x20] sm:$0xff]   ;;  %v575_v8 = vld [vmem:[#allocation7 + $0x10] sm:$0xff]  }
  0x4c   :  { %497 = vmatpush3.bf16.msra.mxu0 %v565_v1  ;;  %517 = vmatpush3.bf16.msra.mxu1 %v573_v4  ;;  %v570_v9 = vld [vmem:[#allocation5 + $0x28] sm:$0xff]   ;;  %v576_v10 = vld [vmem:[#allocation7 + $0x18] sm:$0xff]   ;;  %v571_v11 = vld [vmem:[#allocation5 + $0x30] sm:$0xff]  }
  0x4d   :  { %498 = vmatprep.subr.bf16.mxu0 %v717_v0  ;;  %518 = vmatprep.subr.bf16.mxu1 %v717_v0  ;;  %v577_v12 = vld [vmem:[#allocation7 + $0x20] sm:$0xff]   ;;  %v572_v13 = vld [vmem:[#allocation5 + $0x38] sm:$0xff]   ;;  %v578_v14 = vld [vmem:[#allocation7 + $0x28] sm:$0xff]  }
  0x4e   :  { %v81_v15 = vld [vmem:[#allocation2] sm:$0xf]  ;;  %v579_v16 = vld [vmem:[#allocation7 + $0x30] sm:$0xff]   ;;  %v581_v18 = vld [vmem:[#allocation8] sm:$0xff]  }
  0x4f   :  { %v580_v17 = vld [vmem:[#allocation7 + $0x38] sm:$0xff]   ;;  %v582_v19 = vld [vmem:[#allocation8 + $0x8] sm:$0xff]   ;;  %v583_v20 = vld [vmem:[#allocation8 + $0x10] sm:$0xff]  }
  0x50   :  { %499 = vmatpush3.bf16.msra.mxu0 %v566_v2  ;;  %519 = vmatpush3.bf16.msra.mxu1 %v574_v6  ;;  %v584_v21 = vld [vmem:[#allocation8 + $0x18] sm:$0xff]   ;;  %v585_v22 = vld [vmem:[#allocation8 + $0x20] sm:$0xff]   ;;  %v586_v23 = vld [vmem:[#allocation8 + $0x28] sm:$0xff]  }
  0x51   :  { %500 = vmatprep.subr.bf16.mxu0 %v717_v0  ;;  %520 = vmatprep.subr.bf16.mxu1 %v717_v0  ;;  %v442_v24 = vld [vmem:[%s870_s2] ss:$0 sm:$0xff]  ;;  %v587_v32 = vld [vmem:[#allocation8 + $0x30] sm:$0xff]  }
  0x52   :  { %v588_v33 = vld [vmem:[#allocation8 + $0x38] sm:$0xff]  }
  0x53   :  { %v451_v34 = vld [vmem:[%s872_s4] ss:$0 sm:$0xff]  ;;  %s719_s4 = smov [#allocation10]  }
  0x54   :  { %501 = vmatpush3.bf16.msra.mxu0 %v567_v3  ;;  %521 = vmatpush3.bf16.msra.mxu1 %v575_v8  ;;  %v460_v42 = vld [vmem:[%s874_s6] ss:$0 sm:$0xff]  ;;  %s431_s28 = sshll.u32 %s719_s4, 4  ;;  %s432_s28 = int_to_ptr.vmem [resolvable:$true] %s431_s28 }
  0x55   :  { %502 = vmatprep.subr.bf16.mxu0 %v717_v0  ;;  %522 = vmatprep.subr.bf16.mxu1 %v717_v0  ;;  %s681_s29 = scalar_lea.vmem %s432_s28, 128  ;;  %p686_p5 = scmp.lt.s32.totalorder %s432_s28, %s432_s28 }
  0x56   :  { %p682_p4 = scmp.ne.s32.totalorder %s432_s28, %s681_s29  ;;  %p687_p6 = scmp.lt.s32.totalorder %s681_s29, %s681_s29 }
  0x58   :  { %503 = vmatpush3.bf16.msra.mxu0 %v568_v5  ;;  %523 = vmatpush3.bf16.msra.mxu1 %v576_v10  ;;  %p688_p7 = por %p687_p6, %p686_p5 }
  0x59   :  { %504 = vmatprep.subr.bf16.mxu0 %v717_v0  ;;  %524 = vmatprep.subr.bf16.mxu1 %v717_v0 }
  0x5a   :  { %p689_p8 = pnand %p688_p7, %p682_p4 }
  0x5c   :  { %505 = vmatpush3.bf16.msra.mxu0 %v569_v7  ;;  %525 = vmatpush3.bf16.msra.mxu1 %v577_v12 }
  0x5d   :  { %506 = vmatprep.subr.bf16.mxu0 %v717_v0  ;;  %526 = vmatprep.subr.bf16.mxu1 %v717_v0 }
  0x60   :  { %507 = vmatpush3.bf16.msra.mxu0 %v570_v9  ;;  %527 = vmatpush3.bf16.msra.mxu1 %v578_v14 }
  0x61   :  { %508 = vmatprep.subr.bf16.mxu0 %v717_v0  ;;  %528 = vmatprep.subr.bf16.mxu1 %v717_v0 }
  0x64   :  { %509 = vmatpush3.bf16.msra.mxu0 %v571_v11  ;;  %529 = vmatpush3.bf16.msra.mxu1 %v579_v16 }
  0x65   :  { %510 = vmatprep.subr.bf16.mxu0 %v717_v0  ;;  %530 = vmatprep.subr.bf16.mxu1 %v717_v0 }
  0x68   :  { %511 = vmatpush3.bf16.msra.mxu0 %v572_v13  ;;  %531 = vmatpush3.bf16.msra.mxu1 %v580_v17 }
  0x69   :  { %536 = vmatprep.subr.bf16.mxu0 %v717_v0 }
  0x6b   :  { %513 = vmatmul.mubr.bf16.vlgmr.msra.gmra.mrb[0].mxu0 %v81_v15 }
  0x6c   :  { %552 = vmatprep.mubr.msk.bf16.mxu0 %vm718_vm0, %v717_v0  ;;  %537 = vmatpush3.bf16.msra.mxu0 %v581_v18 }
  0x6d   :  { %538 = vmatprep.subr.bf16.mxu0 %v717_v0 }
  0x70   :  { %539 = vmatpush3.bf16.msra.mxu0 %v582_v19 }
  0x71   :  { %540 = vmatprep.subr.bf16.mxu0 %v717_v0 }
  0x74   :  { %541 = vmatpush3.bf16.msra.mxu0 %v583_v20 }
  0x75   :  { %542 = vmatprep.subr.bf16.mxu0 %v717_v0 }
  0x78   :  { %543 = vmatpush3.bf16.msra.mxu0 %v584_v21 }
  0x79   :  { %544 = vmatprep.subr.bf16.mxu0 %v717_v0 }
  0x7c   :  { %545 = vmatpush3.bf16.msra.mxu0 %v585_v22 }
  0x7d   :  { %546 = vmatprep.subr.bf16.mxu0 %v717_v0 }
  0x80   :  { %547 = vmatpush3.bf16.msra.mxu0 %v586_v23 }
  0x81   :  { %548 = vmatprep.subr.bf16.mxu0 %v717_v0 }
  0x84   :  { %549 = vmatpush3.bf16.msra.mxu0 %v587_v32 }
  0x85   :  { %550 = vmatprep.subr.bf16.mxu0 %v717_v0 }
  0x88   :  { %551 = vmatpush3.bf16.msra.mxu0 %v588_v33 }
 0x13e   :  { %v187_v25 = vpop.f32.mrb[0].mxu0 }
 0x13f   :  { %v188_v26 = vadd.f32 %v442_v24, %v187_v25  ;;  %v514_v27 = vpop.f32.mrb[1].mxu0 }
 0x140   :  { %v190_v28 = vpop.f32.mrb[2].mxu0 }
 0x141   :  { %v193_v29 = vmax.f32 %v188_v26, 0.0  ;;  %v515_v30 = vpop.f32.mrb[3].mxu0 }
 0x143   :  { %v194_v31 = vpack.c.bf16 %v193_v29, %v193_v29 }
 0x145   :  { %533 = vmatmul.mubr.bf16.vlgmr.msra.gmra.mrb[0].mxu1 %v194_v31 }
 0x218   :  { %v300_v35 = vpop.f32.mrb[0].mxu1 }
 0x219   :  { %v301_v36 = vadd.f32 %v451_v34, %v300_v35  ;;  %v534_v37 = vpop.f32.mrb[1].mxu1 }
 0x21a   :  { %v303_v38 = vpop.f32.mrb[2].mxu1 }
 0x21b   :  { %v306_v39 = vmax.f32 %v301_v36, 0.0  ;;  %v535_v40 = vpop.f32.mrb[3].mxu1 }
 0x21d   :  { %v307_v41 = vpack.c.bf16 %v306_v39, %v306_v39 }
 0x21f   :  { %553 = vmatmul.mubr.bf16.vlgmr.msra.gmra.mrb[4].mxu0 %v307_v41 }
 0x2f2   :  { %v413_v43 = vpop.f32.mrb[4].mxu0 }
 0x2f3   :  { %v414_v44 = vadd.f32 %v460_v42, %v413_v43  ;;  %v554_v45 = vpop.f32.mrb[5].mxu0 }
 0x2f4   :  { %v416_v46 = vpop.f32.mrb[6].mxu0 }
 0x2f5   :  { %v419_v47 = vsub.f32 0.0, %v414_v44  ;;  %v555_v48 = vpop.f32.mrb[7].mxu0 }
 0x2f7   :  { %v420_v49 = vmul.f32 1.442695, %v419_v47 }
 0x2f9   :  { %589 = vpow2.f32 %v420_v49 }
 0x303   :  { %v590_v50 = vpop.eup %589 }
 0x304   :  { %v422_v51 = vadd.f32 1.0, %v590_v50 }
 0x306   :  { %591 = vrcp.f32 %v422_v51 }
 0x310   :  { %v592_v52 = vpop.eup %591 }
 0x311   :  { %424 = vst [vmem:[#allocation10] sm:$0xff] %v592_v52 }
 0x312   :  { %692 = shalt.err (!%p689_p8)
}
 0x313   :  { %s693_s8 = scalar_lea.hbm %s875_s7, 128 }
 0x314   :  { %p694_p9 = scmp.ne.s32.totalorder %s875_s7, %s693_s8  ;;  %p697_p10 = scmp.lt.u32.totalorder %s693_s8, %s875_s7 }
 0x316   :  { %p699_p11 = pnand %p697_p10, %p694_p9 }
 0x318   :  { %702 = shalt.err (!%p699_p11)
}
 0x319   :  { %434 = dma.vmem_to_hbm [thread:$0]  %s432_s28, 128, %s875_s7, [#allocation4]  }
 0x31a   :  { %709 = dma.done.wait [#allocation4], 128  }
 0x31b   :  { %710 = vsyncadd [#allocation4], 4294967168 }
 0x31c   :  { %438 = vsyncpa [#allocation3], 1 }
 0x31d   :  { %439 = vsyncpa [#allocation6], 1 }
 0x31e   :  { %440 = vsyncpa [#allocation9], 1 }
 0x31f   :  { %441 = vsyncpa [#allocation4], 1 }

</bundles_post_ra>
